<compile_context>
chip_gen: v7x
topology: tpu7x:2x2x1
jax: 0.10.0
libtpu: 0.0.40
codegen_flags: <defaults>
</compile_context>

<pallas_src>
import jax
import jax.numpy as jnp
import numpy as np
from jax.experimental import pallas as pl
from jax.experimental.pallas import tpu as pltpu


def trading_mlp_kernel(x_ref, w1_ref, b1_ref, w2_ref, b2_ref, w3_ref, b3_ref,
                       o_ref):
    # x_ref: (18, TB) bf16 -- batch on lanes.  Weights (out, in) bf16,
    # biases (out, 1) fp32.  Output tile: (1, TB) fp32, lane-dense.
    xt = x_ref[...]                                                  # (18, TB)

    h1 = jnp.dot(w1_ref[...], xt,
                 preferred_element_type=jnp.float32) + b1_ref[...]  # (64, TB)
    h1 = jnp.maximum(h1, 0.0).astype(jnp.bfloat16)                   # ReLU

    h2 = jnp.dot(w2_ref[...], h1,
                 preferred_element_type=jnp.float32) + b2_ref[...]  # (32, TB)
    h2 = jnp.maximum(h2, 0.0).astype(jnp.bfloat16)                   # ReLU

    h3 = jnp.dot(w3_ref[...], h2,
                 preferred_element_type=jnp.float32) + b3_ref[...]  # (1, TB)
    o_ref[...] = jnp.tanh(h3)


def trading_model_forward(x, params, *, block_batch=512):
    """TradingModel forward.  x: (B, 18) float32 -> (B, 1) float32."""
    w1, b1, w2, b2, w3, b3 = params          # PyTorch layout: w (out, in), b (out,)
    B = x.shape[0]

    # Batch tile: multiple of 128 (lane width), capped at block_batch.
    tb = min(block_batch, pl.cdiv(B, 128) * 128)
    n_tiles = pl.cdiv(B, tb)
    b_pad = n_tiles * tb

    # Transpose so the batch lives on lanes; cast the streamed data to bf16.
    xt = jnp.transpose(x).astype(jnp.bfloat16)                      # (18, B)
    if b_pad != B:
        xt = jnp.pad(xt, ((0, 0), (0, b_pad - B)))

    w1b, w2b, w3b = (w.astype(jnp.bfloat16) for w in (w1, w2, w3))
    b1c, b2c, b3c = (b.reshape(-1, 1).astype(jnp.float32) for b in (b1, b2, b3))

    def resident(a):
        # Full-array block with a constant index_map: stays VMEM-resident.
        return pl.BlockSpec(a.shape, lambda i: (0, 0))

    out = pl.pallas_call(
        trading_mlp_kernel,
        out_shape=jax.ShapeDtypeStruct((1, b_pad), jnp.float32),
        grid=(n_tiles,),
        in_specs=[
            pl.BlockSpec((18, tb), lambda i: (0, i)),   # x tile, batch on lanes
            resident(w1b), resident(b1c),
            resident(w2b), resident(b2c),
            resident(w3b), resident(b3c),
        ],
        out_specs=pl.BlockSpec((1, tb), lambda i: (0, i)),           # lane-dense
        compiler_params=pltpu.CompilerParams(
            dimension_semantics=("parallel",)),
    )(xt, w1b, b1c, w2b, b2c, w3b, b3c)

    return out[0, :B].reshape(B, 1)


def init_params(key):
    """Deterministic init mimicking torch.nn.Linear's U(-1/sqrt(fan_in), ...)."""
    def linear(key, fan_in, fan_out):
        kw, kb = jax.random.split(key)
        bound = 1.0 / np.sqrt(fan_in)
        w = jax.random.uniform(kw, (fan_out, fan_in), jnp.float32,
                               minval=-bound, maxval=bound)
        b = jax.random.uniform(kb, (fan_out,), jnp.float32,
                               minval=-bound, maxval=bound)
        return w, b

    k1, k2, k3 = jax.random.split(key, 3)
    w1, b1 = linear(k1, 18, 64)
    w2, b2 = linear(k2, 64, 32)
    w3, b3 = linear(k3, 32, 1)
    return w1, b1, w2, b2, w3, b3


def reference_forward(x, params):
    """Pure-JAX reference with the same bf16-input / fp32-accumulate recipe."""
    w1, b1, w2, b2, w3, b3 = params

    def layer(h, w, b):
        return jnp.dot(h.astype(jnp.bfloat16), w.T.astype(jnp.bfloat16),
                       preferred_element_type=jnp.float32) + b

    h1 = jnp.maximum(layer(x, w1, b1), 0.0)
    h2 = jnp.maximum(layer(h1, w2, b2), 0.0)
    return jnp.tanh(layer(h2, w3, b3))


if __name__ == "__main__":
    key = jax.random.PRNGKey(0)
    k_params, k_x = jax.random.split(key)
    params = init_params(k_params)

    # B=600 exercises the multi-tile grid path (TB=512 -> 2 tiles + padding);
    # B=8 exercises the tiny-batch / single-tile path.
    for B in (600, 8):
        kx = jax.random.fold_in(k_x, B)
        x = jax.random.normal(kx, (B, 18), dtype=jnp.float32)

        out = jax.block_until_ready(trading_model_forward(x, params))
        ref = jax.block_until_ready(reference_forward(x, params))
        np.testing.assert_allclose(np.asarray(out), np.asarray(ref),
                                   rtol=2e-3, atol=2e-3)

    print("KERNEL_OK")
</pallas_src>

<mosaic_0001>
module attributes {stable_mosaic.version = 11 : i64} {
  func.func @trading_mlp_kernel(%arg0: i32, %arg1: memref<18x512xbf16, #tpu.memory_space<vmem>>, %arg2: memref<64x18xbf16, #tpu.memory_space<vmem>>, %arg3: memref<64x1xf32, #tpu.memory_space<vmem>>, %arg4: memref<32x64xbf16, #tpu.memory_space<vmem>>, %arg5: memref<32x1xf32, #tpu.memory_space<vmem>>, %arg6: memref<1x32xbf16, #tpu.memory_space<vmem>>, %arg7: memref<1x1xf32, #tpu.memory_space<vmem>>, %arg8: memref<1x512xf32, #tpu.memory_space<vmem>>) attributes {dimension_semantics = [#tpu.dimension_semantics<parallel>], iteration_bounds = array<i64: 2>, scalar_prefetch = 0 : i64, scratch_operands = 0 : i64, tpu.core_type = #tpu.core_type<tc>, window_params = [{transform_indices = @transform_0, window_bounds = array<i64: 18, 512>}, {pipeline_mode = #tpu.pipeline_mode<synchronous>, transform_indices = @transform_1, window_bounds = array<i64: 64, 18>}, {pipeline_mode = #tpu.pipeline_mode<synchronous>, transform_indices = @transform_2, window_bounds = array<i64: 64, 1>}, {pipeline_mode = #tpu.pipeline_mode<synchronous>, transform_indices = @transform_3, window_bounds = array<i64: 32, 64>}, {pipeline_mode = #tpu.pipeline_mode<synchronous>, transform_indices = @transform_4, window_bounds = array<i64: 32, 1>}, {pipeline_mode = #tpu.pipeline_mode<synchronous>, transform_indices = @transform_5, window_bounds = array<i64: 1, 32>}, {pipeline_mode = #tpu.pipeline_mode<synchronous>, transform_indices = @transform_6, window_bounds = array<i64: 1, 1>}, {transform_indices = @transform_7, window_bounds = array<i64: 1, 512>}]} {
    %c0 = arith.constant 0 : index
    %c0_0 = arith.constant 0 : index
    %0 = vector.load %arg1[%c0, %c0_0] : memref<18x512xbf16, #tpu.memory_space<vmem>>, vector<18x512xbf16>
    %c0_1 = arith.constant 0 : index
    %c0_2 = arith.constant 0 : index
    %1 = vector.load %arg2[%c0_1, %c0_2] : memref<64x18xbf16, #tpu.memory_space<vmem>>, vector<64x18xbf16>
    %cst = arith.constant dense<0.000000e+00> : vector<64x512xf32>
    %2 = tpu.matmul %1, %0, %cst {dimension_numbers = #tpu.dot_dimension_numbers<[1], [0], [0], [1], [0, 0, 1, 1], [], []>} : vector<64x18xbf16>, vector<18x512xbf16>, vector<64x512xf32> -> vector<64x512xf32>
    %c0_3 = arith.constant 0 : index
    %c0_4 = arith.constant 0 : index
    %3 = vector.load %arg3[%c0_3, %c0_4] : memref<64x1xf32, #tpu.memory_space<vmem>>, vector<64x1xf32>
    %4 = vector.broadcast %3 : vector<64x1xf32> to vector<64x512xf32>
    %5 = arith.addf %2, %4 : vector<64x512xf32>
    %cst_5 = arith.constant 0.000000e+00 : f32
    %6 = vector.broadcast %cst_5 : f32 to vector<64x512xf32>
    %7 = arith.maximumf %5, %6 : vector<64x512xf32>
    %8 = arith.truncf %7 : vector<64x512xf32> to vector<64x512xbf16>
    %c0_6 = arith.constant 0 : index
    %c0_7 = arith.constant 0 : index
    %9 = vector.load %arg4[%c0_6, %c0_7] : memref<32x64xbf16, #tpu.memory_space<vmem>>, vector<32x64xbf16>
    %cst_8 = arith.constant dense<0.000000e+00> : vector<32x512xf32>
    %10 = tpu.matmul %9, %8, %cst_8 {dimension_numbers = #tpu.dot_dimension_numbers<[1], [0], [0], [1], [0, 0, 1, 1], [], []>} : vector<32x64xbf16>, vector<64x512xbf16>, vector<32x512xf32> -> vector<32x512xf32>
    %c0_9 = arith.constant 0 : index
    %c0_10 = arith.constant 0 : index
    %11 = vector.load %arg5[%c0_9, %c0_10] : memref<32x1xf32, #tpu.memory_space<vmem>>, vector<32x1xf32>
    %12 = vector.broadcast %11 : vector<32x1xf32> to vector<32x512xf32>
    %13 = arith.addf %10, %12 : vector<32x512xf32>
    %cst_11 = arith.constant 0.000000e+00 : f32
    %14 = vector.broadcast %cst_11 : f32 to vector<32x512xf32>
    %15 = arith.maximumf %13, %14 : vector<32x512xf32>
    %16 = arith.truncf %15 : vector<32x512xf32> to vector<32x512xbf16>
    %c0_12 = arith.constant 0 : index
    %c0_13 = arith.constant 0 : index
    %17 = vector.load %arg6[%c0_12, %c0_13] : memref<1x32xbf16, #tpu.memory_space<vmem>>, vector<1x32xbf16>
    %cst_14 = arith.constant dense<0.000000e+00> : vector<1x512xf32>
    %18 = tpu.matmul %17, %16, %cst_14 {dimension_numbers = #tpu.dot_dimension_numbers<[1], [0], [0], [1], [0, 0, 1, 1], [], []>} : vector<1x32xbf16>, vector<32x512xbf16>, vector<1x512xf32> -> vector<1x512xf32>
    %c0_15 = arith.constant 0 : index
    %c0_16 = arith.constant 0 : index
    %19 = vector.load %arg7[%c0_15, %c0_16] : memref<1x1xf32, #tpu.memory_space<vmem>>, vector<1x1xf32>
    %20 = vector.broadcast %19 : vector<1x1xf32> to vector<1x512xf32>
    %21 = arith.addf %18, %20 : vector<1x512xf32>
    %22 = math.tanh %21 : vector<1x512xf32>
    %c0_17 = arith.constant 0 : index
    %c0_18 = arith.constant 0 : index
    %23 = vector.load %arg8[%c0_17, %c0_18] : memref<1x512xf32, #tpu.memory_space<vmem>>, vector<1x512xf32>
    tpu.vector_store %arg8[%c0_17, %c0_18], %22 {strides = array<i32>} : memref<1x512xf32, #tpu.memory_space<vmem>>, vector<1x512xf32>,
    return
  }
  func.func @transform_0(%arg0: i32) -> (i32, i32) {
    %c0_i32 = arith.constant 0 : i32
    %c0_i32_0 = arith.constant 0 : i32
    return %c0_i32, %arg0 : i32, i32
  }
  func.func @transform_1(%arg0: i32) -> (i32, i32) {
    %c0_i32 = arith.constant 0 : i32
    %c0_i32_0 = arith.constant 0 : i32
    %c0_i32_1 = arith.constant 0 : i32
    return %c0_i32, %c0_i32_0 : i32, i32
  }
  func.func @transform_2(%arg0: i32) -> (i32, i32) {
    %c0_i32 = arith.constant 0 : i32
    %c0_i32_0 = arith.constant 0 : i32
    %c0_i32_1 = arith.constant 0 : i32
    return %c0_i32, %c0_i32_0 : i32, i32
  }
  func.func @transform_3(%arg0: i32) -> (i32, i32) {
    %c0_i32 = arith.constant 0 : i32
    %c0_i32_0 = arith.constant 0 : i32
    %c0_i32_1 = arith.constant 0 : i32
    return %c0_i32, %c0_i32_0 : i32, i32
  }
  func.func @transform_4(%arg0: i32) -> (i32, i32) {
    %c0_i32 = arith.constant 0 : i32
    %c0_i32_0 = arith.constant 0 : i32
    %c0_i32_1 = arith.constant 0 : i32
    return %c0_i32, %c0_i32_0 : i32, i32
  }
  func.func @transform_5(%arg0: i32) -> (i32, i32) {
    %c0_i32 = arith.constant 0 : i32
    %c0_i32_0 = arith.constant 0 : i32
    %c0_i32_1 = arith.constant 0 : i32
    return %c0_i32, %c0_i32_0 : i32, i32
  }
  func.func @transform_6(%arg0: i32) -> (i32, i32) {
    %c0_i32 = arith.constant 0 : i32
    %c0_i32_0 = arith.constant 0 : i32
    %c0_i32_1 = arith.constant 0 : i32
    return %c0_i32, %c0_i32_0 : i32, i32
  }
  func.func @transform_7(%arg0: i32) -> (i32, i32) {
    %c0_i32 = arith.constant 0 : i32
    %c0_i32_0 = arith.constant 0 : i32
    return %c0_i32, %arg0 : i32, i32
  }
}

</mosaic_0001>

<bundles_post_ra>
// kernel: tpu_custom_call.1
= control target key start
LH: loop header
LB: loop body
LE: loop exit
PB: predicated region body
PF: predicated region fallthrough
CT: control target
= control target key end

     0   :  { %s1452_s0 = inlined_call_operand.vmem [shape: bf16[18,1024], index: 0, kind: input, shape index: {}]   ;;  %s1453_s1 = inlined_call_operand.vmem [shape: bf16[64,18], index: 1, kind: input, shape index: {}]   ;;  %s1454_s2 = inlined_call_operand.vmem [shape: f32[64,1], index: 2, kind: input, shape index: {}]   ;;  %s1455_s3 = inlined_call_operand.vmem [shape: bf16[32,64], index: 3, kind: input, shape index: {}]   ;;  %s1456_s4 = inlined_call_operand.vmem [shape: f32[32,1], index: 4, kind: input, shape index: {}]   ;;  %s1457_s5 = inlined_call_operand.vmem [shape: bf16[1,32], index: 5, kind: input, shape index: {}]   ;;  %s1458_s6 = inlined_call_operand.<no memory space> [shape: f32[1,1], index: 6, kind: input, shape index: {}]   ;;  %s1459_s7 = inlined_call_operand.hbm [shape: f32[1,1024], index: 7, kind: output, shape index: {}]  }
   0x1   :  { %v12_v0 = vstv %s1458_s6 }
   0x2   :  { %13 = vst [vmem:[#allocation2] sm:$0x1] %v12_v0 }
   0x3   :  { %14 = vsyncpa [#allocation5], 0 }
   0x4   :  { %16 = vsyncpa [#allocation5 + $0x1], 0  ;;  %s1257_s26 = smov 0   ;;  %s1259_s27 = smov 0  }
   0x5   :  { %s1261_s28 = smov 0   ;;  %s1263_s29 = smov 0  }
   0x6 LB: > { %s1033_s6 = sadd.s32 4294967295, %s1209_s29   ;;  %s1034_s30 = sadd.s32 4294967294, %s1209_s29   ;;  %s1209_s29 = sphi %s1263_s29, %s1465_s29   ;;  %s1205_s28 = sphi %s1261_s28, %s1464_s28   ;;  %s1201_s27 = sphi %s1259_s27, %s1463_s27   ;;  %s1197_s26 = sphi %s1257_s26, %s1462_s26  }
   0x7   : > { %s1280_s8 = sadd.s32 1, %s1209_s29   ;;  %s29_s9 = sadd.s32 1, %s1205_s28 }
   0x8   : > { %s26_s10 = ssub.s32 %s1209_s29, %s1280_s8  ;;  %p36_p0 = scmp.ne.s32.totalorder %s1205_s28, %s1201_s27 }
   0x9   : > { %p27_p1 = scmp.eq.s32.totalorder %s26_s10, 0  ;;  %p37_p2 = scmp.eq.s32.totalorder %s1209_s29, 0 }
   0xa   : > { %p192_p3 = scmp.eq.s32.totalorder %s1033_s6, 1  ;;  %p197_p4 = scmp.ne.s32.totalorder %s1201_s27, %s1197_s26 }
   0xb   : > { %s1293_s11 = scalar_select %p27_p1, %s1205_s28, %s29_s9  }
   0xc   : > { %p38_p5 = por %p37_p2, %p36_p0  ;;  %p1295_p6 = por %p192_p3, %p36_p0 }
   0xd   : > { %p198_p7 = scmp.eq.s32.totalorder %s1034_s30, 1  ;;  %p1036_p9 = scmp.ge.s32.totalorder %s1209_s29, 2 }
   0xf   : > { %p1299_p8 = por %p198_p7, %p197_p4  ;;  %232 = sbr.rel (%p1036_p9) target bundleno = 29 (0x1d), region = 40 }
  0x16   : > { %235 = sbr.rel (!%p38_p5) target bundleno = 29 (0x1d), region = 44  ;;  %s237_s14 = sand.u32 (%p38_p5), 1, %s1205_s28  }
  0x17   : > { %s1076_s15 = sshll.u32 (%p38_p5), %s1209_s29, 4  ;;  %s1078_s16 = smul.u32 (%p38_p5), 48, %s237_s14 }
  0x18   : > { %s242_s19 = scalar_lea.vmem (%p38_p5), %s1452_s0, %s1076_s15 }
  0x19   : > { %v255_v1 = vld [vmem:[%s242_s19] sm:$0xff] (%p38_p5)  ;;  %v257_v2 = vld [vmem:[%s242_s19 + $0x8] sm:$0xff] (%p38_p5)  ;;  %s239_s20 = scalar_lea.vmem (%p38_p5), [#allocation3], %s1078_s16 }
  0x1a   : > { %v259_v3 = vld [vmem:[%s242_s19 + $0x20] sm:$0xff] (%p38_p5)  ;;  %v261_v4 = vld [vmem:[%s242_s19 + $0x28] sm:$0xff] (%p38_p5)  ;;  %256 = vst [vmem:[%s239_s20] sm:$0xff] (%p38_p5), %v255_v1  ;;  %258 = vst [vmem:[%s239_s20 + $0x8] sm:$0xff] (%p38_p5), %v257_v2 }
  0x1b   : > { %v263_v5 = vld [vmem:[%s242_s19 + $0x40] sm:$0xff] (%p38_p5)  ;;  %v265_v6 = vld [vmem:[%s242_s19 + $0x48] sm:$0xff] (%p38_p5)  ;;  %260 = vst [vmem:[%s239_s20 + $0x10] sm:$0xff] (%p38_p5), %v259_v3  ;;  %262 = vst [vmem:[%s239_s20 + $0x18] sm:$0xff] (%p38_p5), %v261_v4 }
  0x1c   : > { %264 = vst [vmem:[%s239_s20 + $0x20] sm:$0xff] (%p38_p5), %v263_v5  ;;  %266 = vst [vmem:[%s239_s20 + $0x28] sm:$0xff] (%p38_p5), %v265_v6 }
  0x1d PF: > { %p1039_p10 = scmp.ge.s32.totalorder %s1209_s29, 1  ;;  %p271_p11 = scmp.lt.s32.totalorder %s1209_s29, 3 }
  0x1f   : > { %p272_p12 = pnand %p1039_p10, %p271_p11 }
  0x20   : > { %s1314_s21 = sand.u32 (!%p272_p12), 1, %s1201_s27   ;;  %v1211_v7 = vmov (!%p272_p12), 0   ;;  %vm437_vm0 = vcmask (!%p272_p12), 1040384   ;;  %v326_v18 = vld [vmem:[%s1454_s2] sm:$0xff] (!%p272_p12)  ;;  %v328_v20 = vld [vmem:[%s1454_s2 + $0x10] sm:$0xff] (!%p272_p12)  ;;  %v327_v22 = vld [vmem:[%s1454_s2 + $0x8] sm:$0xff] (!%p272_p12) }
  0x21   : > { %275 = sbr.rel (%p272_p12) target bundleno = 778 (0x30a), region = 67  ;;  %482 = vmatprep.mubr.bf16.mxu0 (!%p272_p12), %v1211_v7  ;;  %555 = vmatprep.mubr.bf16.mxu1 (!%p272_p12), %v1211_v7  ;;  %v1133_v23 = vld [vmem:[%s1453_s1] sm:$0xff] (!%p272_p12)   ;;  %v329_v24 = vld [vmem:[%s1454_s2 + $0x18] sm:$0xff] (!%p272_p12)  ;;  %vm424_vm1 = vcmask (!%p272_p12), 146432   ;;  %v331_v26 = vld [vmem:[%s1454_s2 + $0x28] sm:$0xff] (!%p272_p12)  ;;  %vm682_vm2 = vcmask (!%p272_p12), 523264  }
  0x22   : > { %s1079_s22 = smul.u32 (!%p272_p12), 48, %s1314_s21  ;;  %1121 = vset.pattern.permute.xlu0 (!%p272_p12), %v1211_v7  ;;  %1122 = vset.pattern.permute.xlu1 (!%p272_p12), %v1211_v7  ;;  %v330_v25 = vld [vmem:[%s1454_s2 + $0x20] sm:$0xff] (!%p272_p12)  ;;  %v332_v27 = vld [vmem:[%s1454_s2 + $0x30] sm:$0xff] (!%p272_p12)  ;;  %v1134_v28 = vld [vmem:[%s1453_s1 + $0x8] sm:$0xff] (!%p272_p12)   ;;  %vm830_vm3 = vcmask (!%p272_p12), 261120   ;;  %s1040_s19 = sshll.u32 (!%p272_p12), %s1314_s21, 2 }
  0x23   : > { %336 = vperm.xlu0 (!%p272_p12), %1121, %v326_v18   ;;  %346 = vperm.xlu1 (!%p272_p12), %1122, %v328_v20   ;;  %v333_v29 = vld [vmem:[%s1454_s2 + $0x38] sm:$0xff] (!%p272_p12)  ;;  %v648_v30 = vld [vmem:[%s1456_s4] sm:$0xff] (!%p272_p12)  ;;  %v649_v31 = vld [vmem:[%s1456_s4 + $0x8] sm:$0xff] (!%p272_p12)  ;;  %s1077_s20 = sshll.u32 (!%p272_p12), %s1033_s6, 6  ;;  %s955_s9 = scalar_lea.sflag (!%p272_p12), [#allocation5], %s1314_s21 }
  0x24   : > { %s280_s23 = scalar_lea.vmem (!%p272_p12), [#allocation3], %s1079_s22  ;;  %v650_v32 = vld [vmem:[%s1456_s4 + $0x10] sm:$0xff] (!%p272_p12)  ;;  %v651_v34 = vld [vmem:[%s1456_s4 + $0x18] sm:$0xff] (!%p272_p12)  ;;  %v820_v35 = vld [vmem:[#allocation2] sm:$0x1] (!%p272_p12)  ;;  %s308_s22 = scalar_lea.vmem (!%p272_p12), [#allocation4], %s1040_s19 }
  0x25   : > { %v1123_v8 = vld [vmem:[%s280_s23 + $0x4] ss:$16 sps:$4 sm:$0xff] (!%p272_p12)   ;;  %v1125_v9 = vld [vmem:[%s280_s23 + $0xc] ss:$16 sps:$4 sm:$0xff] (!%p272_p12)   ;;  %v1127_v10 = vld [vmem:[%s280_s23] ss:$16 sps:$4 sm:$0xff] (!%p272_p12)   ;;  %s1408_s30 = scalar_lea.hbm (!%p272_p12), %s1459_s7, %s1077_s20 }
  0x26   : > { %450 = vmatprep.subr.bf16.mxu0 (!%p272_p12), %v1123_v8  ;;  %v1128_v11 = vld [vmem:[%s280_s23 + $0x8] ss:$16 sps:$4 sm:$0xff] (!%p272_p12)   ;;  %v316_v12 = vld [vmem:[%s280_s23 + $0x20] sm:$0x11] (!%p272_p12)  ;;  %523 = vmatprep.subr.bf16.mxu1 (!%p272_p12), %v1125_v9  ;;  %s1213_s6 = smov (!%p272_p12), [#allocation4]  }
  0x27   : > { %v1050_v13 = vcombine.high (!%p272_p12), %v316_v12, %v316_v12  ;;  %v317_v14 = vld [vmem:[%s280_s23 + $0x28] sm:$0x11] (!%p272_p12)  ;;  %v1049_v15 = vcombine.low (!%p272_p12), %v316_v12, %v316_v12  ;;  %451 = vmatpush1.bf16.msra.mxu0 (!%p272_p12), %v1127_v10  ;;  %524 = vmatpush1.bf16.msra.mxu1 (!%p272_p12), %v1128_v11  ;;  %v1135_v33 = vld [vmem:[%s1453_s1 + $0x10] sm:$0xff] (!%p272_p12)   ;;  %s969_s23 = sshll.u32 (!%p272_p12), %s308_s22, 4  ;;  %s1151_s14 = sshll.u32 (!%p272_p12), %s1213_s6, 4  ;;  %s1410_s23 = int_to_ptr.vmem [resolvable:$true] %s969_s23  ;;  %s1152_s14 = int_to_ptr.vmem [resolvable:$false] %s1151_s14 }
  0x28   : > { %v1052_v16 = vcombine.high %v317_v14, %v317_v14  ;;  %v1051_v17 = vcombine.low %v317_v14, %v317_v14  ;;  %341 = vperm.xlu0 %1121, %v327_v22   ;;  %351 = vperm.xlu1 %1122, %v329_v24   ;;  %v1136_v36 = vld [vmem:[%s1453_s1 + $0x18] sm:$0xff]   ;;  %s1147_s10 = scalar_lea.vmem %s1410_s23, 64  ;;  %s1153_s15 = scalar_lea.vmem %s1152_s14, 128 }
  0x29   : > { %1053 = vmatprep.subr.msk.bf16.mxu0 %vm437_vm0, %v1050_v13  ;;  %v439_v19 = vsel %vm437_vm0, %v1049_v15, 0  ;;  %p1148_p13 = scmp.ne.s32.totalorder %s1410_s23, %s1147_s10  ;;  %p1154_p2 = scmp.lt.s32.totalorder %s1410_s23, %s1152_s14 }
  0x2a   : > { %1058 = vmatprep.subr.msk.bf16.mxu1 %vm437_vm0, %v1052_v16  ;;  %v445_v21 = vsel %vm437_vm0, %v1051_v17, 0  ;;  %p1155_p3 = scmp.lt.s32.totalorder %s1153_s15, %s1147_s10 }
  0x2b   : > { %453 = vmatpush1.bf16.msra.mxu0 %v439_v19  ;;  %526 = vmatpush1.bf16.msra.mxu1 %v445_v21  ;;  %p1149_p0 = pnand %p1148_p13, %p1295_p6 }
  0x2c   : > { %356 = vperm.xlu0 %1121, %v330_v25   ;;  %361 = vperm.xlu1 %1122, %v331_v26   ;;  %p1156_p4 = por %p1155_p3, %p1154_p2 }
  0x2d   : > { %p1150_p1 = pneg %p1149_p0 }
  0x2e   : > { %1054 = vmatmul.mubr.msk.bf16.vlgmr.msra.gmra.mrb[0].mxu0 %vm424_vm1, %v1133_v23  ;;  %1059 = vmatmul.mubr.msk.bf16.vlgmr.msra.gmra.mrb[0].mxu1 %vm424_vm1, %v1133_v23 }
  0x2f   : > { %492 = vmatprep.mubr.bf16.mxu0 %v1211_v7  ;;  %565 = vmatprep.mubr.bf16.mxu1 %v1211_v7  ;;  %p1157_p5 = pnand %p1156_p4, %p1150_p1 }
  0x30   : > { %366 = vperm.xlu0 %1121, %v332_v27   ;;  %371 = vperm.xlu1 %1122, %v333_v29  }
  0x34   : > { %654 = vperm.xlu0 %1121, %v648_v30   ;;  %659 = vperm.xlu1 %1122, %v649_v31  }
  0x36   : > { %1055 = vmatmul.mubr.msk.bf16.gmra.mrb[4].mxu0 %vm424_vm1, %v1134_v28  ;;  %1060 = vmatmul.mubr.msk.bf16.gmra.mrb[4].mxu1 %vm424_vm1, %v1134_v28 }
  0x37   : > { %502 = vmatprep.mubr.bf16.mxu0 %v1211_v7  ;;  %575 = vmatprep.mubr.bf16.mxu1 %v1211_v7 }
  0x38   : > { %664 = vperm.xlu0 %1121, %v650_v32   ;;  %669 = vperm.xlu1 %1122, %v651_v34  }
  0x3c   : > { %823 = vperm.xlu0 %1121, %v820_v35  }
  0x3e   : > { %1056 = vmatmul.mubr.msk.bf16.gmra.mrb[8].mxu0 %vm424_vm1, %v1135_v33  ;;  %1061 = vmatmul.mubr.msk.bf16.gmra.mrb[8].mxu1 %vm424_vm1, %v1135_v33 }
  0x3f   : > { %512 = vmatprep.mubr.bf16.mxu0 %v1211_v7  ;;  %585 = vmatprep.mubr.bf16.mxu1 %v1211_v7 }
  0x46   : > { %1057 = vmatmul.mubr.msk.bf16.gmra.mrb[12].mxu0 %vm424_vm1, %v1136_v36  ;;  %1062 = vmatmul.mubr.msk.bf16.gmra.mrb[12].mxu1 %vm424_vm1, %v1136_v36 }
  0x47   : > { %721 = vmatprep.mubr.bf16.mxu0 %v1211_v7  ;;  %774 = vmatprep.mubr.bf16.mxu1 %v1211_v7 }
  0xa2   : > { %v337_v37 = vpop.permute.xlu0 %336  ;;  %v347_v39 = vpop.permute.xlu1 %346 }
  0xa7   : > { %v342_v38 = vpop.permute.xlu0 %341  ;;  %v352_v0 = vpop.permute.xlu1 %351 }
  0xab   : > { %v357_v30 = vpop.permute.xlu0 %356  ;;  %v362_v31 = vpop.permute.xlu1 %361 }
 0x101   : > { %v484_v40 = vpop.f32.mrb[0].mxu0  ;;  %v557_v41 = vpop.f32.mrb[0].mxu1 }
 0x102   : > { %v485_v42 = vadd.f32 %v484_v40, %v337_v37  ;;  %v558_v43 = vadd.f32 %v557_v41, %v337_v37  ;;  %v486_v44 = vpop.f32.mrb[1].mxu0  ;;  %v559_v45 = vpop.f32.mrb[1].mxu1 }
 0x103   : > { %v487_v46 = vadd.f32 %v486_v44, %v337_v37  ;;  %v560_v47 = vadd.f32 %v559_v45, %v337_v37  ;;  %v488_v48 = vpop.f32.mrb[2].mxu0  ;;  %v561_v49 = vpop.f32.mrb[2].mxu1 }
 0x104   : > { %v489_v50 = vadd.f32 %v488_v48, %v342_v38  ;;  %v562_v51 = vadd.f32 %v561_v49, %v342_v38  ;;  %v490_v52 = vpop.f32.mrb[3].mxu0  ;;  %v563_v53 = vpop.f32.mrb[3].mxu1  ;;  %v596_v56 = vmax.f32 %v485_v42, 0.0  ;;  %v598_v57 = vmax.f32 %v558_v43, 0.0 }
 0x105   : > { %v491_v54 = vadd.f32 %v490_v52, %v342_v38  ;;  %v564_v55 = vadd.f32 %v563_v53, %v342_v38  ;;  %v597_v60 = vmax.f32 %v487_v46, 0.0  ;;  %v599_v61 = vmax.f32 %v560_v47, 0.0 }
 0x106   : > { %v600_v58 = vmax.f32 %v489_v50, 0.0  ;;  %v602_v59 = vmax.f32 %v562_v51, 0.0 }
 0x107   : > { %v601_v62 = vmax.f32 %v491_v54, 0.0  ;;  %v603_v63 = vmax.f32 %v564_v55, 0.0 }
 0x108   : > { %v628_v1 = vpack.c.bf16 %v600_v58, %v596_v56  ;;  %v630_v2 = vpack.c.bf16 %v602_v59, %v598_v57 }
 0x109   : > { %v629_v3 = vpack.c.bf16 %v601_v62, %v597_v60  ;;  %v631_v4 = vpack.c.bf16 %v603_v63, %v599_v61  ;;  %v494_v5 = vpop.f32.mrb[4].mxu0  ;;  %v567_v6 = vpop.f32.mrb[4].mxu1 }
 0x10a   : > { %v495_v8 = vadd.f32 %v494_v5, %v347_v39  ;;  %v568_v9 = vadd.f32 %v567_v6, %v347_v39  ;;  %v496_v10 = vpop.f32.mrb[5].mxu0  ;;  %v569_v11 = vpop.f32.mrb[5].mxu1 }
 0x10b   : > { %v497_v12 = vadd.f32 %v496_v10, %v347_v39  ;;  %v570_v13 = vadd.f32 %v569_v11, %v347_v39  ;;  %v498_v14 = vpop.f32.mrb[6].mxu0  ;;  %v571_v15 = vpop.f32.mrb[6].mxu1  ;;  %689 = vmatprep.subr.bf16.mxu0 %v629_v3  ;;  %742 = vmatprep.subr.bf16.mxu1 %v631_v4 }
 0x10c   : > { %v499_v16 = vadd.f32 %v498_v14, %v352_v0  ;;  %v572_v17 = vadd.f32 %v571_v15, %v352_v0  ;;  %v500_v18 = vpop.f32.mrb[7].mxu0  ;;  %v573_v19 = vpop.f32.mrb[7].mxu1  ;;  %690 = vmatpush1.bf16.msra.mxu0 %v628_v1  ;;  %743 = vmatpush1.bf16.msra.mxu1 %v630_v2  ;;  %v604_v22 = vmax.f32 %v495_v8, 0.0  ;;  %v606_v23 = vmax.f32 %v568_v9, 0.0 }
 0x10d   : > { %v501_v20 = vadd.f32 %v500_v18, %v352_v0  ;;  %v574_v21 = vadd.f32 %v573_v19, %v352_v0  ;;  %v605_v26 = vmax.f32 %v497_v12, 0.0  ;;  %v607_v27 = vmax.f32 %v570_v13, 0.0  ;;  %v367_v60 = vpop.permute.xlu0 %366  ;;  %v372_v61 = vpop.permute.xlu1 %371 }
 0x10e   : > { %v608_v24 = vmax.f32 %v499_v16, 0.0  ;;  %v610_v25 = vmax.f32 %v572_v17, 0.0 }
 0x10f   : > { %v609_v28 = vmax.f32 %v501_v20, 0.0  ;;  %v611_v29 = vmax.f32 %v574_v21, 0.0 }
 0x110   : > { %v632_v32 = vpack.c.bf16 %v608_v24, %v604_v22  ;;  %v634_v33 = vpack.c.bf16 %v610_v25, %v606_v23 }
 0x111   : > { %v633_v34 = vpack.c.bf16 %v609_v28, %v605_v26  ;;  %v635_v35 = vpack.c.bf16 %v611_v29, %v607_v27  ;;  %v504_v36 = vpop.f32.mrb[8].mxu0  ;;  %v577_v37 = vpop.f32.mrb[8].mxu1 }
 0x112   : > { %v505_v38 = vadd.f32 %v504_v36, %v357_v30  ;;  %v578_v39 = vadd.f32 %v577_v37, %v357_v30  ;;  %v506_v40 = vpop.f32.mrb[9].mxu0  ;;  %v579_v41 = vpop.f32.mrb[9].mxu1 }
 0x113   : > { %v507_v42 = vadd.f32 %v506_v40, %v357_v30  ;;  %v580_v43 = vadd.f32 %v579_v41, %v357_v30  ;;  %v508_v44 = vpop.f32.mrb[10].mxu0  ;;  %v581_v45 = vpop.f32.mrb[10].mxu1  ;;  %691 = vmatprep.subr.bf16.mxu0 %v633_v34  ;;  %744 = vmatprep.subr.bf16.mxu1 %v635_v35 }
 0x114   : > { %v509_v46 = vadd.f32 %v508_v44, %v362_v31  ;;  %v582_v47 = vadd.f32 %v581_v45, %v362_v31  ;;  %v510_v48 = vpop.f32.mrb[11].mxu0  ;;  %v583_v49 = vpop.f32.mrb[11].mxu1  ;;  %692 = vmatpush1.bf16.msra.mxu0 %v632_v32  ;;  %745 = vmatpush1.bf16.msra.mxu1 %v634_v33  ;;  %v612_v52 = vmax.f32 %v505_v38, 0.0  ;;  %v614_v53 = vmax.f32 %v578_v39, 0.0  ;;  %v1138_v32 = vld [vmem:[%s1455_s3 + $0x8] sm:$0xff]  }
 0x115   : > { %v511_v50 = vadd.f32 %v510_v48, %v362_v31  ;;  %v584_v51 = vadd.f32 %v583_v49, %v362_v31  ;;  %v613_v56 = vmax.f32 %v507_v42, 0.0  ;;  %v615_v57 = vmax.f32 %v580_v43, 0.0  ;;  %v1137_v31 = vld [vmem:[%s1455_s3] sm:$0xff]   ;;  %v655_v33 = vpop.permute.xlu0 %654  ;;  %v660_v34 = vpop.permute.xlu1 %659 }
 0x116   : > { %v616_v54 = vmax.f32 %v509_v46, 0.0  ;;  %v618_v55 = vmax.f32 %v582_v47, 0.0 }
 0x117   : > { %v617_v58 = vmax.f32 %v511_v50, 0.0  ;;  %v619_v59 = vmax.f32 %v584_v51, 0.0 }
 0x118   : > { %v636_v62 = vpack.c.bf16 %v616_v54, %v612_v52  ;;  %v638_v63 = vpack.c.bf16 %v618_v55, %v614_v53 }
 0x119   : > { %v637_v0 = vpack.c.bf16 %v617_v58, %v613_v56  ;;  %v639_v1 = vpack.c.bf16 %v619_v59, %v615_v57  ;;  %v514_v2 = vpop.f32.mrb[12].mxu0  ;;  %v587_v3 = vpop.f32.mrb[12].mxu1 }
 0x11a   : > { %v515_v4 = vadd.f32 %v514_v2, %v367_v60  ;;  %v588_v5 = vadd.f32 %v587_v3, %v367_v60  ;;  %v516_v6 = vpop.f32.mrb[13].mxu0  ;;  %v589_v8 = vpop.f32.mrb[13].mxu1 }
 0x11b   : > { %v517_v9 = vadd.f32 %v516_v6, %v367_v60  ;;  %v590_v10 = vadd.f32 %v589_v8, %v367_v60  ;;  %v518_v11 = vpop.f32.mrb[14].mxu0  ;;  %v591_v12 = vpop.f32.mrb[14].mxu1  ;;  %693 = vmatprep.subr.bf16.mxu0 %v637_v0  ;;  %746 = vmatprep.subr.bf16.mxu1 %v639_v1 }
 0x11c   : > { %v519_v13 = vadd.f32 %v518_v11, %v372_v61  ;;  %v592_v14 = vadd.f32 %v591_v12, %v372_v61  ;;  %v520_v15 = vpop.f32.mrb[15].mxu0  ;;  %v593_v16 = vpop.f32.mrb[15].mxu1  ;;  %694 = vmatpush1.bf16.msra.mxu0 %v636_v62  ;;  %747 = vmatpush1.bf16.msra.mxu1 %v638_v63  ;;  %v620_v19 = vmax.f32 %v515_v4, 0.0  ;;  %v622_v20 = vmax.f32 %v588_v5, 0.0 }
 0x11d   : > { %v521_v17 = vadd.f32 %v520_v15, %v372_v61  ;;  %v594_v18 = vadd.f32 %v593_v16, %v372_v61  ;;  %v621_v23 = vmax.f32 %v517_v9, 0.0  ;;  %v623_v24 = vmax.f32 %v590_v10, 0.0  ;;  %v665_v58 = vpop.permute.xlu0 %664  ;;  %v670_v59 = vpop.permute.xlu1 %669 }
 0x11e   : > { %v624_v21 = vmax.f32 %v519_v13, 0.0  ;;  %v626_v22 = vmax.f32 %v592_v14, 0.0 }
 0x11f   : > { %v625_v25 = vmax.f32 %v521_v17, 0.0  ;;  %v627_v26 = vmax.f32 %v594_v18, 0.0 }
 0x120   : > { %v640_v27 = vpack.c.bf16 %v624_v21, %v620_v19  ;;  %v642_v28 = vpack.c.bf16 %v626_v22, %v622_v20 }
 0x121   : > { %v641_v29 = vpack.c.bf16 %v625_v25, %v621_v23  ;;  %v643_v30 = vpack.c.bf16 %v627_v26, %v623_v24 }
 0x123   : > { %695 = vmatprep.subr.bf16.mxu0 %v641_v29  ;;  %748 = vmatprep.subr.bf16.mxu1 %v643_v30  ;;  %v819_v29 = vld [vmem:[%s1457_s5] sm:$0x1]  ;;  %v826_v30 = vlaneseq }
 0x124   : > { %696 = vmatpush1.bf16.msra.mxu0 %v640_v27  ;;  %749 = vmatpush1.bf16.msra.mxu1 %v642_v28 }
 0x125   : > { %vm951_vm4 = vcmp.lt.s32.totalorder %v826_v30, 512 }
 0x127   : > { %1065 = vmatmul.mubr.msk.bf16.vlgmr.msra.gmra.mrb[16].mxu0 %vm682_vm2, %v1137_v31  ;;  %1067 = vmatmul.mubr.msk.bf16.vlgmr.msra.gmra.mrb[16].mxu1 %vm682_vm2, %v1137_v31  ;;  %v827_v31 = vshrl.u32 %v826_v30, 7 }
 0x128   : > { %731 = vmatprep.mubr.bf16.mxu0 %v1211_v7  ;;  %784 = vmatprep.mubr.bf16.mxu1 %v1211_v7 }
 0x12f   : > { %1066 = vmatmul.mubr.msk.bf16.gmra.mrb[20].mxu0 %vm682_vm2, %v1138_v32  ;;  %1068 = vmatmul.mubr.msk.bf16.gmra.mrb[20].mxu1 %vm682_vm2, %v1138_v32  ;;  %v828_v32 = vsub.s32 0, %v827_v31 }
 0x130   : > { %866 = vmatprep.mubr.bf16.mxu0 %v1211_v7  ;;  %907 = vmatprep.mubr.bf16.mxu1 %v1211_v7 }
 0x1fa   : > { %v723_v35 = vpop.f32.mrb[16].mxu0  ;;  %v776_v36 = vpop.f32.mrb[16].mxu1 }
 0x1fb   : > { %v724_v37 = vadd.f32 %v723_v35, %v655_v33  ;;  %v777_v38 = vadd.f32 %v776_v36, %v655_v33  ;;  %v725_v39 = vpop.f32.mrb[17].mxu0  ;;  %v778_v40 = vpop.f32.mrb[17].mxu1 }
 0x1fc   : > { %v726_v41 = vadd.f32 %v725_v39, %v655_v33  ;;  %v779_v42 = vadd.f32 %v778_v40, %v655_v33  ;;  %v727_v43 = vpop.f32.mrb[18].mxu0  ;;  %v780_v44 = vpop.f32.mrb[18].mxu1 }
 0x1fd   : > { %v728_v45 = vadd.f32 %v727_v43, %v660_v34  ;;  %v781_v46 = vadd.f32 %v780_v44, %v660_v34  ;;  %v729_v47 = vpop.f32.mrb[19].mxu0  ;;  %v782_v48 = vpop.f32.mrb[19].mxu1  ;;  %v795_v51 = vmax.f32 %v724_v37, 0.0  ;;  %v797_v7 = vmax.f32 %v777_v38, 0.0 }
 0x1fe   : > { %v730_v49 = vadd.f32 %v729_v47, %v660_v34  ;;  %v783_v50 = vadd.f32 %v782_v48, %v660_v34  ;;  %v796_v54 = vmax.f32 %v726_v41, 0.0  ;;  %v798_v55 = vmax.f32 %v779_v42, 0.0  ;;  %v824_v33 = vpop.permute.xlu0 %823 }
 0x1ff   : > { %v799_v52 = vmax.f32 %v728_v45, 0.0  ;;  %v801_v53 = vmax.f32 %v781_v46, 0.0  ;;  %v829_v34 = vrot.slane %v824_v33, %v828_v32  ;;  %v1212_v47 = vmov 1966171168  }
 0x200   : > { %v800_v56 = vmax.f32 %v730_v49, 0.0  ;;  %v802_v57 = vmax.f32 %v783_v50, 0.0  ;;  %v927_v48 = vunpack.c.l.s4 %v1212_v47 }
 0x201   : > { %v811_v60 = vpack.c.bf16 %v799_v52, %v795_v51  ;;  %v813_v61 = vpack.c.bf16 %v801_v53, %v797_v7 }
 0x202   : > { %v812_v62 = vpack.c.bf16 %v800_v56, %v796_v54  ;;  %v814_v63 = vpack.c.bf16 %v802_v57, %v798_v55  ;;  %v733_v0 = vpop.f32.mrb[20].mxu0  ;;  %v786_v1 = vpop.f32.mrb[20].mxu1  ;;  %v928_v49 = vunpack.c.0.s8 %v927_v48 }
 0x203   : > { %v734_v2 = vadd.f32 %v733_v0, %v665_v58  ;;  %v787_v3 = vadd.f32 %v786_v1, %v665_v58  ;;  %v735_v4 = vpop.f32.mrb[21].mxu0  ;;  %v788_v5 = vpop.f32.mrb[21].mxu1 }
 0x204   : > { %v736_v6 = vadd.f32 %v735_v4, %v665_v58  ;;  %v789_v8 = vadd.f32 %v788_v5, %v665_v58  ;;  %v737_v9 = vpop.f32.mrb[22].mxu0  ;;  %v790_v10 = vpop.f32.mrb[22].mxu1  ;;  %834 = vmatprep.subr.bf16.mxu0 %v812_v62  ;;  %875 = vmatprep.subr.bf16.mxu1 %v814_v63  ;;  %v931_v7 = vsub.s32 %v928_v49, %v827_v31 }
 0x205   : > { %v738_v11 = vadd.f32 %v737_v9, %v670_v59  ;;  %v791_v12 = vadd.f32 %v790_v10, %v670_v59  ;;  %v739_v13 = vpop.f32.mrb[23].mxu0  ;;  %v792_v14 = vpop.f32.mrb[23].mxu1  ;;  %835 = vmatpush1.bf16.msra.mxu0 %v811_v60  ;;  %876 = vmatpush1.bf16.msra.mxu1 %v813_v61  ;;  %v803_v17 = vmax.f32 %v734_v2, 0.0  ;;  %v805_v18 = vmax.f32 %v787_v3, 0.0 }
 0x206   : > { %v740_v15 = vadd.f32 %v739_v13, %v670_v59  ;;  %v793_v16 = vadd.f32 %v792_v14, %v670_v59  ;;  %v804_v21 = vmax.f32 %v736_v6, 0.0  ;;  %v806_v22 = vmax.f32 %v789_v8, 0.0 }
 0x207   : > { %v807_v19 = vmax.f32 %v738_v11, 0.0  ;;  %v809_v20 = vmax.f32 %v791_v12, 0.0 }
 0x208   : > { %v808_v23 = vmax.f32 %v740_v15, 0.0  ;;  %v810_v24 = vmax.f32 %v793_v16, 0.0 }
 0x209   : > { %v815_v25 = vpack.c.bf16 %v807_v19, %v803_v17  ;;  %v817_v26 = vpack.c.bf16 %v809_v20, %v805_v18 }
 0x20a   : > { %v816_v27 = vpack.c.bf16 %v808_v23, %v804_v21  ;;  %v818_v28 = vpack.c.bf16 %v810_v24, %v806_v22 }
 0x20c   : > { %836 = vmatprep.subr.bf16.mxu0 %v816_v27  ;;  %877 = vmatprep.subr.bf16.mxu1 %v818_v28 }
 0x20d   : > { %837 = vmatpush1.bf16.msra.mxu0 %v815_v25  ;;  %878 = vmatpush1.bf16.msra.mxu1 %v817_v26 }
 0x210   : > { %1069 = vmatmul.mubr.msk.bf16.vlgmr.msra.gmra.mrb[24].mxu0 %vm830_vm3, %v819_v29  ;;  %1070 = vmatmul.mubr.msk.bf16.vlgmr.msra.gmra.mrb[24].mxu1 %vm830_vm3, %v819_v29 }
 0x2e3   : > { %v868_v35 = vpop.f32.mrb[24].mxu0  ;;  %v909_v36 = vpop.f32.mrb[24].mxu1 }
 0x2e4   : > { %v869_v37 = vadd.f32 %v868_v35, %v829_v34  ;;  %v910_v38 = vadd.f32 %v909_v36, %v829_v34  ;;  %v870_v39 = vpop.f32.mrb[25].mxu0  ;;  %v911_v40 = vpop.f32.mrb[25].mxu1 }
 0x2e5   : > { %v871_v41 = vadd.f32 %v870_v39, %v829_v34  ;;  %v912_v42 = vadd.f32 %v911_v40, %v829_v34  ;;  %v872_v43 = vpop.f32.mrb[26].mxu0  ;;  %v913_v44 = vpop.f32.mrb[26].mxu1 }
 0x2e6   : > { %1139 = vtanh.f32 %v869_v37  ;;  %v873_v45 = vpop.f32.mrb[27].mxu0  ;;  %v914_v46 = vpop.f32.mrb[27].mxu1 }
 0x2e7   : > { %1141 = vtanh.f32 %v910_v38 }
 0x2e8   : > { %1143 = vtanh.f32 %v871_v41 }
 0x2e9   : > { %1145 = vtanh.f32 %v912_v42 }
 0x2f0   : > { %v1140_v50 = vpop.eup %1139 }
 0x2f1   : > { %v1142_v51 = vpop.eup %1141 }
 0x2f2   : > { %v1144_v52 = vpop.eup %1143 }
 0x2f3   : > { %v1146_v53 = vpop.eup %1145  ;;  %v924_v54 = vcombine.low %v1140_v50, %v1144_v52 }
 0x2f4   : > { %v925_v55 = vcombine.low %v1142_v51, %v1146_v53 }
 0x2f5   : > { %v932_v56 = vrot.slane %v924_v54, %v931_v7 }
 0x2f6   : > { %v939_v57 = vrot.slane %v925_v55, %v931_v7 }
 0x2f8   : > { %v940_v58 = vcombine.low %v932_v56, %v939_v57 }
 0x2fa   : > { %v947_v59 = vrot.slane %v940_v58, %v931_v7 }
 0x2fc   : > { %953 = vst.msk [vmem:[%s308_s22] sm:$0xf] %vm951_vm4, %v947_v59 }
 0x2fd   : > { %1160 = shalt.err (!%p1157_p5)
}
 0x2fe   : > { %s1161_s21 = scalar_lea.hbm %s1408_s30, 64  ;;  %s1165_s18 = scalar_lea.hbm %s1459_s7, 128 }
 0x2ff   : > { %p1162_p7 = scmp.ne.s32.totalorder %s1408_s30, %s1161_s21  ;;  %p1166_p12 = scmp.lt.u32.totalorder %s1408_s30, %s1459_s7 }
 0x300   : > { %p1167_p13 = scmp.lt.u32.totalorder %s1165_s18, %s1161_s21  ;;  %p1169_p1 = scmp.lt.u32.totalorder %s1161_s21, %s1408_s30 }
 0x301   : > { %p1163_p10 = pnand %p1162_p7, %p1295_p6 }
 0x302   : > { %p1168_p0 = por %p1167_p13, %p1166_p12 }
 0x303   : > { %p1164_p11 = pneg %p1163_p10 }
 0x304   : > { %p1170_p2 = por %p1169_p1, %p1168_p0 }
 0x306   : > { %p1171_p3 = pnand %p1170_p2, %p1164_p11 }
 0x308   : > { %1174 = shalt.err (!%p1171_p3)
}
 0x309   : > { %1080 = dma.vmem_to_hbm [thread:$0]  (%p1295_p6), %s1410_s23, 64, %s1408_s30, %s955_s9  }
 0x30a PF: > { %s981_s22 = sand.u32 1, %s1197_s26   ;;  %p1083_p4 = pnand %p1036_p9, %p1299_p8 }
 0x30b   : > { %s982_s24 = scalar_lea.sflag [#allocation5], %s981_s22 }
 0x30c   : > { %1192 = dma.done.wait (!%p1083_p4), %s982_s24, 64  }
 0x30d   : > { %1194 = vsyncadd (!%p1083_p4), %s982_s24, 4294967232  ;;  %p19_p5 = scmp.ge.s32.totalorder %s1280_s8, 4   ;;  %s1462_s26 = smov %s1201_s27 }
 0x30e   : > { %s1463_s27 = smov %s1205_s28  ;;  %s1464_s28 = smov %s1293_s11 }
 0x30f   : > { %s1465_s29 = smov %s1280_s8  ;;  %21 = sbr.rel (!%p19_p5) target bundleno = 6 (0x6), region = 111 }
 0x316   :  { %987 = vsyncpa [#allocation5], 1 }
 0x317   :  { %989 = vsyncpa [#allocation5 + $0x1], 1 }

</bundles_post_ra>
